<compile_context>
chip_gen: v7x
topology: tpu7x:2x2x1
jax: 0.10.0
libtpu: 0.0.40
codegen_flags: <defaults>
</compile_context>

<pallas_src>
import functools

import jax
import jax.numpy as jnp
from jax.experimental import pallas as pl
from jax.experimental.pallas import tpu as pltpu

LANE = 128     # vreg lane width
SUBLANE = 8    # vreg sublane count (f32)


def _round_up(x, m):
    return ((x + m - 1) // m) * m


def _pick_batch_tile(B, block_b):
    """Batch tile: big when B is big; otherwise split in two (>=2 grid steps
    keeps both v7x TensorCores busy) as soon as B >= 2 sublanes."""
    if B >= 2 * block_b:
        return block_b
    if B >= 2 * SUBLANE:
        return _round_up(pl.cdiv(B, 2), SUBLANE)
    return _round_up(B, SUBLANE)


def hnet_kernel(x_ref, w1_ref, b1_ref, w2_ref, b2_ref, o_ref):
    # Cast the activation tile to the weight dtype in VMEM (no-op on the f32
    # path); MXU accumulation stays f32 via preferred_element_type.
    x = x_ref[...].astype(w1_ref.dtype)
    h = jnp.dot(x, w1_ref[...], preferred_element_type=jnp.float32)
    h = jnp.maximum(h + b1_ref[...], 0.0)          # b1 is [1, H_p], broadcasts over rows
    y = jnp.dot(h.astype(w2_ref.dtype), w2_ref[...],
                preferred_element_type=jnp.float32)
    o_ref[...] = (y + b2_ref[...]).astype(o_ref.dtype)


@functools.partial(jax.jit, static_argnames=("block_b", "use_bf16"))
def hnet_forward(x, w1, b1, w2, b2, *, block_b=2048, use_bf16=False):
    """Fused HNet forward: relu(x @ W1 + b1) @ W2 + b2.

    x : [B, d_in] (f32)
    w1: [d_in, h], b1: [h], w2: [h, d_out], b2: [d_out]   (weights stored [in, out])
    Returns [B, d_out] in x.dtype.
    """
    B, d_in = x.shape
    h_dim = w1.shape[1]
    d_out = w2.shape[1]

    # Lane-dense padding of the hidden dim only (weights are tiny & one-time).
    h_p = _round_up(h_dim, LANE)

    w_dtype = jnp.bfloat16 if use_bf16 else w1.dtype
    w1_p = jnp.pad(w1, ((0, 0), (0, h_p - h_dim))).astype(w_dtype)
    w2_p = jnp.pad(w2, ((0, h_p - h_dim), (0, 0))).astype(w_dtype)
    # Biases stay f32 (added onto the f32 accumulator), shaped [1, N].
    b1_p = jnp.pad(b1, (0, h_p - h_dim)).reshape(1, h_p).astype(jnp.float32)
    b2_p = b2.reshape(1, d_out).astype(jnp.float32)

    tb = _pick_batch_tile(B, block_b)
    grid = (pl.cdiv(B, tb),)

    x_item = jnp.dtype(x.dtype).itemsize
    w_item = jnp.dtype(w_dtype).itemsize
    out_item = jnp.dtype(x.dtype).itemsize

    # VMEM budget: double-buffered x/out tiles + single-buffered resident
    # weights/biases, plus headroom for the (tb, h_p) f32 intermediate and
    # compiler scratch.  Capped at 48 MiB so the same config fits v7x (64 MiB).
    buf_bytes = (2 * tb * d_in * x_item
                 + 2 * tb * d_out * out_item
                 + (d_in * h_p + h_p * d_out) * w_item
                 + (h_p + d_out) * 4
                 + tb * h_p * 4)
    vmem_limit = int(min(buf_bytes + (16 << 20), 48 << 20))

    cost = pl.CostEstimate(
        flops=2 * B * (d_in * h_p + h_p * d_out),
        transcendentals=0,
        bytes_accessed=(B * d_in * x_item                       # x (read once, unpadded)
                        + (d_in * h_p + h_p * d_out) * w_item   # weights
                        + (h_p + d_out) * 4                     # biases
                        + B * d_out * out_item),                # output (unpadded)
    )

    resident = dict(pipeline_mode=pl.Buffered(buffer_count=1))

    out = pl.pallas_call(
        hnet_kernel,
        out_shape=jax.ShapeDtypeStruct((B, d_out), x.dtype),
        grid_spec=pltpu.PrefetchScalarGridSpec(
            num_scalar_prefetch=0,
            grid=grid,
            in_specs=[
                # batch-tiled activations: full (unpadded) feature dim, no HBM copy
                pl.BlockSpec((tb, d_in), lambda i: (i, 0)),
                # weights / biases: constant block index -> fetched once,
                # VMEM-resident, single-buffered.
                pl.BlockSpec((d_in, h_p), lambda i: (0, 0), **resident),
                pl.BlockSpec((1, h_p), lambda i: (0, 0), **resident),
                pl.BlockSpec((h_p, d_out), lambda i: (0, 0), **resident),
                pl.BlockSpec((1, d_out), lambda i: (0, 0), **resident),
            ],
            out_specs=pl.BlockSpec((tb, d_out), lambda i: (i, 0)),
        ),
        compiler_params=pltpu.CompilerParams(
            # batch tiles are independent -> megacore / v7x 2-TC sharding
            dimension_semantics=("parallel",),
            vmem_limit_bytes=vmem_limit,
        ),
        cost_estimate=cost,
    )(x, w1_p, b1_p, w2_p, b2_p)

    return out


def init_hnet_params(key, dim_of_input, dim_of_layer0, dim_of_output):
    """Deterministic init mimicking nn.Linear (uniform +/- 1/sqrt(fan_in))."""
    k1, k2, k3, k4 = jax.random.split(key, 4)
    lim1 = 1.0 / jnp.sqrt(dim_of_input)
    lim2 = 1.0 / jnp.sqrt(dim_of_layer0)
    # Stored already-transposed: [in, out] so the kernel does x @ W.
    w1 = jax.random.uniform(k1, (dim_of_input, dim_of_layer0),
                            minval=-lim1, maxval=lim1, dtype=jnp.float32)
    b1 = jax.random.uniform(k2, (dim_of_layer0,),
                            minval=-lim1, maxval=lim1, dtype=jnp.float32)
    w2 = jax.random.uniform(k3, (dim_of_layer0, dim_of_output),
                            minval=-lim2, maxval=lim2, dtype=jnp.float32)
    b2 = jax.random.uniform(k4, (dim_of_output,),
                            minval=-lim2, maxval=lim2, dtype=jnp.float32)
    return w1, b1, w2, b2


def _ref_forward(x, w1, b1, w2, b2):
    return jnp.maximum(x @ w1 + b1, 0.0) @ w2 + b2


if __name__ == "__main__":
    # Module-consistent small shapes:
    #   batch=8, dim_of_input=32, config.h_net['dim_of_layer0']=64, dim_of_output=16
    B, D_IN, H, D_OUT = 8, 32, 64, 16

    key = jax.random.PRNGKey(0)
    kx, kp, kx2 = jax.random.split(key, 3)
    x = jax.random.normal(kx, (B, D_IN), dtype=jnp.float32)
    w1, b1, w2, b2 = init_hnet_params(kp, D_IN, H, D_OUT)

    # ---- f32 path (default; exact vs reference) ----
    out = hnet_forward(x, w1, b1, w2, b2)
    out = jax.block_until_ready(out)
    ref = _ref_forward(x, w1, b1, w2, b2)
    assert out.shape == (B, D_OUT)
    assert jnp.allclose(out, ref, atol=1e-5, rtol=1e-5), "f32 path mismatch"

    # ---- larger batch exercises the batch grid (>=2 steps, partial last block) ----
    B2 = 1000  # deliberately not a multiple of the tile: exercises masked last block
    x2 = jax.random.normal(kx2, (B2, D_IN), dtype=jnp.float32)
    out2 = jax.block_until_ready(hnet_forward(x2, w1, b1, w2, b2))
    ref2 = _ref_forward(x2, w1, b1, w2, b2)
    assert out2.shape == (B2, D_OUT)
    assert jnp.allclose(out2, ref2, atol=1e-4, rtol=1e-4), "batched f32 path mismatch"

    # ---- bf16 matmul path (all generations; weights bf16, f32 accumulation) ----
    out_bf16 = jax.block_until_ready(hnet_forward(x2, w1, b1, w2, b2, use_bf16=True))
    assert jnp.allclose(out_bf16, ref2, atol=5e-2, rtol=5e-2), "bf16 path mismatch"

    print("KERNEL_OK")
</pallas_src>

<mosaic_0001>
module attributes {stable_mosaic.version = 11 : i64} {
  func.func @hnet_kernel(%arg0: i32, %arg1: memref<8x32xf32, #tpu.memory_space<vmem>>, %arg2: memref<32x128xf32, #tpu.memory_space<vmem>>, %arg3: memref<1x128xf32, #tpu.memory_space<vmem>>, %arg4: memref<128x16xf32, #tpu.memory_space<vmem>>, %arg5: memref<1x16xf32, #tpu.memory_space<vmem>>, %arg6: memref<8x16xf32, #tpu.memory_space<vmem>>) attributes {dimension_semantics = [#tpu.dimension_semantics<parallel>], iteration_bounds = array<i64: 1>, scalar_prefetch = 0 : i64, scratch_operands = 0 : i64, tpu.core_type = #tpu.core_type<tc>, window_params = [{transform_indices = @transform_0, window_bounds = array<i64: 8, 32>}, {pipeline_mode = #tpu.pipeline_mode<synchronous>, transform_indices = @transform_1, window_bounds = array<i64: 32, 128>}, {pipeline_mode = #tpu.pipeline_mode<synchronous>, transform_indices = @transform_2, window_bounds = array<i64: 1, 128>}, {pipeline_mode = #tpu.pipeline_mode<synchronous>, transform_indices = @transform_3, window_bounds = array<i64: 128, 16>}, {pipeline_mode = #tpu.pipeline_mode<synchronous>, transform_indices = @transform_4, window_bounds = array<i64: 1, 16>}, {transform_indices = @transform_5, window_bounds = array<i64: 8, 16>}]} {
    %c0 = arith.constant 0 : index
    %c0_0 = arith.constant 0 : index
    %0 = vector.load %arg1[%c0, %c0_0] : memref<8x32xf32, #tpu.memory_space<vmem>>, vector<8x32xf32>
    %c0_1 = arith.constant 0 : index
    %c0_2 = arith.constant 0 : index
    %1 = vector.load %arg2[%c0_1, %c0_2] : memref<32x128xf32, #tpu.memory_space<vmem>>, vector<32x128xf32>
    %cst = arith.constant dense<0.000000e+00> : vector<8x128xf32>
    %2 = tpu.matmul %0, %1, %cst {dimension_numbers = #tpu.dot_dimension_numbers<[1], [0], [0], [1], [0, 0, 1, 1], [], []>} : vector<8x32xf32>, vector<32x128xf32>, vector<8x128xf32> -> vector<8x128xf32>
    %c0_3 = arith.constant 0 : index
    %c0_4 = arith.constant 0 : index
    %3 = vector.load %arg3[%c0_3, %c0_4] : memref<1x128xf32, #tpu.memory_space<vmem>>, vector<1x128xf32>
    %4 = vector.broadcast %3 : vector<1x128xf32> to vector<8x128xf32>
    %5 = arith.addf %2, %4 : vector<8x128xf32>
    %cst_5 = arith.constant 0.000000e+00 : f32
    %6 = vector.broadcast %cst_5 : f32 to vector<8x128xf32>
    %7 = arith.maximumf %5, %6 : vector<8x128xf32>
    %c0_6 = arith.constant 0 : index
    %c0_7 = arith.constant 0 : index
    %8 = vector.load %arg4[%c0_6, %c0_7] : memref<128x16xf32, #tpu.memory_space<vmem>>, vector<128x16xf32>
    %cst_8 = arith.constant dense<0.000000e+00> : vector<8x16xf32>
    %9 = tpu.matmul %7, %8, %cst_8 {dimension_numbers = #tpu.dot_dimension_numbers<[1], [0], [0], [1], [0, 0, 1, 1], [], []>} : vector<8x128xf32>, vector<128x16xf32>, vector<8x16xf32> -> vector<8x16xf32>
    %c0_9 = arith.constant 0 : index
    %c0_10 = arith.constant 0 : index
    %10 = vector.load %arg5[%c0_9, %c0_10] : memref<1x16xf32, #tpu.memory_space<vmem>>, vector<1x16xf32>
    %11 = vector.broadcast %10 : vector<1x16xf32> to vector<8x16xf32>
    %12 = arith.addf %9, %11 : vector<8x16xf32>
    %c0_11 = arith.constant 0 : index
    %c0_12 = arith.constant 0 : index
    %13 = vector.load %arg6[%c0_11, %c0_12] : memref<8x16xf32, #tpu.memory_space<vmem>>, vector<8x16xf32>
    tpu.vector_store %arg6[%c0_11, %c0_12], %12 {strides = array<i32>} : memref<8x16xf32, #tpu.memory_space<vmem>>, vector<8x16xf32>,
    return
  }
  func.func @transform_0(%arg0: i32) -> (i32, i32) {
    %c0_i32 = arith.constant 0 : i32
    %c0_i32_0 = arith.constant 0 : i32
    return %arg0, %c0_i32 : i32, i32
  }
  func.func @transform_1(%arg0: i32) -> (i32, i32) {
    %c0_i32 = arith.constant 0 : i32
    %c0_i32_0 = arith.constant 0 : i32
    %c0_i32_1 = arith.constant 0 : i32
    return %c0_i32, %c0_i32_0 : i32, i32
  }
  func.func @transform_2(%arg0: i32) -> (i32, i32) {
    %c0_i32 = arith.constant 0 : i32
    %c0_i32_0 = arith.constant 0 : i32
    %c0_i32_1 = arith.constant 0 : i32
    return %c0_i32, %c0_i32_0 : i32, i32
  }
  func.func @transform_3(%arg0: i32) -> (i32, i32) {
    %c0_i32 = arith.constant 0 : i32
    %c0_i32_0 = arith.constant 0 : i32
    %c0_i32_1 = arith.constant 0 : i32
    return %c0_i32, %c0_i32_0 : i32, i32
  }
  func.func @transform_4(%arg0: i32) -> (i32, i32) {
    %c0_i32 = arith.constant 0 : i32
    %c0_i32_0 = arith.constant 0 : i32
    %c0_i32_1 = arith.constant 0 : i32
    return %c0_i32, %c0_i32_0 : i32, i32
  }
  func.func @transform_5(%arg0: i32) -> (i32, i32) {
    %c0_i32 = arith.constant 0 : i32
    %c0_i32_0 = arith.constant 0 : i32
    return %arg0, %c0_i32 : i32, i32
  }
}

</mosaic_0001>

<bundles_post_ra>
// kernel: hnet_forward.1
= control target key start
LH: loop header
LB: loop body
LE: loop exit
PB: predicated region body
PF: predicated region fallthrough
CT: control target
= control target key end

     0   :  { %v346_v3 = vmov 0.0|0.0   ;;  %vm347_vm0 = vmmov 0   ;;  %v348_v6 = vmov 0.0   ;;  %s461_s0 = inlined_call_operand.vmem [shape: f32[8,32], index: 0, kind: input, shape index: {}]   ;;  %s462_s1 = inlined_call_operand.vmem [shape: f32[32,128], index: 1, kind: input, shape index: {}]   ;;  %s463_s2 = inlined_call_operand.vmem [shape: f32[1,128], index: 2, kind: input, shape index: {}]   ;;  %s464_s3 = inlined_call_operand.vmem [shape: f32[128,16], index: 3, kind: input, shape index: {}]   ;;  %s465_s4 = inlined_call_operand.vmem [shape: f32[1,16], index: 4, kind: input, shape index: {}]   ;;  %s466_s5 = inlined_call_operand.hbm [shape: f32[8,16], index: 5, kind: output, shape index: {}]  }
   0x1   :  { %v22_v0 = vld [vmem:[%s462_s1] sm:$0xff]  ;;  %v23_v1 = vld [vmem:[%s462_s1 + $0x8] sm:$0xff]  ;;  %v24_v2 = vld [vmem:[%s462_s1 + $0x10] sm:$0xff]  ;;  %288 = vmatprep.subr.bf16.mxu0 %v346_v3  ;;  %250 = vmatprep.mubr.msk.f32.mxu0 %vm347_vm0, %v348_v6 }
   0x2   :  { %v289_v4 = vpack.c.bf16 %v23_v1, %v22_v0  ;;  %v25_v5 = vld [vmem:[%s462_s1 + $0x18] sm:$0xff]  ;;  %v108_v7 = vld [vmem:[%s464_s3] sm:$0xff]  ;;  %294 = vmatprep.subr.bf16.mxu1 %v346_v3  ;;  %v109_v8 = vld [vmem:[%s464_s3 + $0x8] sm:$0xff]  ;;  %285 = vmatprep.mubr.msk.f32.mxu1 %vm347_vm0, %v348_v6 }
   0x3   :  { %v110_v9 = vld [vmem:[%s464_s3 + $0x10] sm:$0xff]  ;;  %v111_v10 = vld [vmem:[%s464_s3 + $0x18] sm:$0xff]  ;;  %v292_v11 = vpack.c.bf16 %v25_v5, %v24_v2  ;;  %v295_v12 = vpack.c.bf16 %v109_v8, %v108_v7  ;;  %v112_v14 = vld [vmem:[%s464_s3 + $0x20] sm:$0xff] }
   0x4   :  { %290 = vmatpush3.bf16.msra.mxu0 %v289_v4  ;;  %v298_v13 = vpack.c.bf16 %v111_v10, %v110_v9  ;;  %v113_v15 = vld [vmem:[%s464_s3 + $0x28] sm:$0xff] }
   0x5   :  { %291 = vmatprep.subr.bf16.mxu0 %v346_v3  ;;  %296 = vmatpush3.bf16.msra.mxu1 %v295_v12 }
   0x6   :  { %297 = vmatprep.subr.bf16.mxu1 %v346_v3 }
   0x7   :  { %10 = vsyncpa [#allocation3], 0  ;;  %v21_v16 = vld [vmem:[%s461_s0] sm:$0xff]  ;;  %vm33_vm1 = vcmask 261120   ;;  %v301_v17 = vpack.c.bf16 %v113_v15, %v112_v14  ;;  %v114_v18 = vld [vmem:[%s464_s3 + $0x30] sm:$0xff]  ;;  %s349_s11 = smov [#allocation2]  }
   0x8   :  { %293 = vmatpush3.bf16.msra.mxu0 %v292_v11  ;;  %v115_v19 = vld [vmem:[%s464_s3 + $0x38] sm:$0xff]  ;;  %v116_v21 = vld [vmem:[%s464_s3 + $0x40] sm:$0xff]  ;;  %v117_v22 = vld [vmem:[%s464_s3 + $0x48] sm:$0xff]  ;;  %s209_s12 = sshll.u32 %s349_s11, 4  ;;  %vm201_vm2 = vcmask 130048   ;;  %s210_s12 = int_to_ptr.vmem [resolvable:$true] %s209_s12 }
   0x9   :  { %299 = vmatpush3.bf16.msra.mxu1 %v298_v13  ;;  %v304_v20 = vpack.c.bf16 %v115_v19, %v114_v18  ;;  %v307_v23 = vpack.c.bf16 %v117_v22, %v116_v21  ;;  %v118_v24 = vld [vmem:[%s464_s3 + $0x50] sm:$0xff]  ;;  %v119_v25 = vld [vmem:[%s464_s3 + $0x58] sm:$0xff]  ;;  %v120_v27 = vld [vmem:[%s464_s3 + $0x60] sm:$0xff]  ;;  %p327_p1 = scmp.lt.s32.totalorder %s210_s12, %s210_s12 }
   0xa   :  { %300 = vmatprep.subr.bf16.mxu1 %v346_v3  ;;  %v310_v26 = vpack.c.bf16 %v119_v25, %v118_v24  ;;  %v121_v28 = vld [vmem:[%s464_s3 + $0x68] sm:$0xff]  ;;  %v122_v30 = vld [vmem:[%s464_s3 + $0x70] sm:$0xff]  ;;  %v123_v31 = vld [vmem:[%s464_s3 + $0x78] sm:$0xff]  ;;  %s322_s3 = scalar_lea.vmem %s210_s12, 128 }
   0xb   :  { %251 = vmatmul.mubr.msk.f32.vlgmr.msra.gmra.mrb[0].mxu0 %vm33_vm1, %v21_v16  ;;  %v313_v29 = vpack.c.bf16 %v121_v28, %v120_v27  ;;  %v316_v32 = vpack.c.bf16 %v123_v31, %v122_v30  ;;  %v217_v33 = vld [vmem:[%s463_s2] ss:$0 sm:$0xff]  ;;  %p323_p0 = scmp.ne.s32.totalorder %s210_s12, %s322_s3  ;;  %p328_p2 = scmp.lt.s32.totalorder %s322_s3, %s322_s3 }
   0xc   :  { %v219_v38 = vld [vmem:[%s465_s4] ss:$0 sm:$0xff] }
   0xd   :  { %302 = vmatpush3.bf16.msra.mxu1 %v301_v17  ;;  %p329_p3 = por %p328_p2, %p327_p1 }
   0xe   :  { %303 = vmatprep.subr.bf16.mxu1 %v346_v3 }
   0xf   :  { %p330_p4 = pnand %p329_p3, %p323_p0 }
  0x11   :  { %305 = vmatpush3.bf16.msra.mxu1 %v304_v20 }
  0x12   :  { %306 = vmatprep.subr.bf16.mxu1 %v346_v3 }
  0x15   :  { %308 = vmatpush3.bf16.msra.mxu1 %v307_v23 }
  0x16   :  { %309 = vmatprep.subr.bf16.mxu1 %v346_v3 }
  0x19   :  { %311 = vmatpush3.bf16.msra.mxu1 %v310_v26 }
  0x1a   :  { %312 = vmatprep.subr.bf16.mxu1 %v346_v3 }
  0x1d   :  { %314 = vmatpush3.bf16.msra.mxu1 %v313_v29 }
  0x1e   :  { %315 = vmatprep.subr.bf16.mxu1 %v346_v3 }
  0x21   :  { %317 = vmatpush3.bf16.msra.mxu1 %v316_v32 }
  0xde   :  { %v103_v34 = vpop.f32.mrb[0].mxu0 }
  0xdf   :  { %v104_v35 = vadd.f32 %v217_v33, %v103_v34  ;;  %v252_v36 = vpop.f32.mrb[1].mxu0 }
  0xe1   :  { %v107_v37 = vmax.f32 %v104_v35, 0.0 }
  0xe3   :  { %286 = vmatmul.mubr.f32.vlgmr.msra.gmra.mrb[0].mxu1 %v107_v37 }
 0x1b6   :  { %v197_v39 = vpop.f32.mrb[0].mxu1 }
 0x1b7   :  { %v198_v40 = vadd.f32 %v219_v38, %v197_v39  ;;  %v287_v41 = vpop.f32.mrb[1].mxu1 }
 0x1b9   :  { %202 = vst.msk [vmem:[#allocation2] sm:$0xff] %vm201_vm2, %v198_v40 }
 0x1ba   :  { %333 = shalt.err (!%p330_p4)
}
 0x1bb   :  { %s334_s14 = scalar_lea.hbm %s466_s5, 128 }
 0x1bc   :  { %p335_p5 = scmp.ne.s32.totalorder %s466_s5, %s334_s14  ;;  %p338_p6 = scmp.lt.u32.totalorder %s334_s14, %s466_s5 }
 0x1be   :  { %p340_p7 = pnand %p338_p6, %p335_p5 }
 0x1c0   :  { %343 = shalt.err (!%p340_p7)
}
 0x1c1   :  { %212 = dma.vmem_to_hbm [thread:$0]  %s210_s12, 128, %s466_s5, [#allocation3]  }
 0x1c2   :  { %344 = dma.done.wait [#allocation3], 128  }
 0x1c3   :  { %345 = vsyncadd [#allocation3], 4294967168 }
 0x1c4   :  { %216 = vsyncpa [#allocation3], 1 }

</bundles_post_ra>
